<compile_context>
chip_gen: v6e
topology: v6e:2x2x1
jax: 0.10.0
libtpu: 0.0.40
codegen_flags: <defaults>
</compile_context>

<pallas_src>
import functools

import jax
import jax.numpy as jnp
from jax.experimental import pallas as pl
from jax.experimental.pallas import tpu as pltpu


# ---------------------------------------------------------------------------
# Kernels
# ---------------------------------------------------------------------------
def _cam_fused_kernel(gamma_ref, x_ref, o_ref):
    """Whole (bt, C, Np) image resident in VMEM: energy -> softmax -> apply."""
    x = x_ref[...]                                           # (bt, C, Np)
    energy = jax.lax.dot_general(
        x, x,
        dimension_numbers=(((2,), (2,)), ((0,), (0,))),
        preferred_element_type=jnp.float32)                  # (bt, C, C) f32
    row_min = jnp.min(energy, axis=-1, keepdims=True)
    p = jnp.exp(row_min - energy)                            # exponent <= 0
    attn = p * pl.reciprocal(jnp.sum(p, axis=-1, keepdims=True), approx=False)
    out = jax.lax.dot_general(
        attn.astype(x.dtype), x,
        dimension_numbers=(((2,), (1,)), ((0,), (0,))),
        preferred_element_type=jnp.float32)                  # (bt, C, Np) f32
    gamma = gamma_ref[0]
    o_ref[...] = (gamma * out + x.astype(jnp.float32)).astype(o_ref.dtype)


def _cam_attention_kernel(x_ref, attn_ref, acc_ref, *, tc):
    """Pass 1: accumulate energy over N tiles; softmax at the last tile.

    x_ref:    (bt, C, tn)   input tile (native dtype)
    attn_ref: (bt, tc, C)   output row-tile of attention (x.dtype)
    acc_ref:  (bt, tc, C)   f32 accumulator scratch (persists across grid)
    """
    ci = pl.program_id(1)
    k = pl.program_id(2)

    @pl.when(k == 0)
    def _init():
        acc_ref[...] = jnp.zeros_like(acc_ref)

    x_full = x_ref[...]                                      # (bt, C, tn)
    if tc == x_ref.shape[1]:
        x_rows = x_full
    else:
        row0 = pl.multiple_of(ci * tc, 8)
        x_rows = x_ref[:, pl.ds(row0, tc), :]                # (bt, tc, tn)

    # energy rows += x_rows @ x_full^T, contracting the shared N (lane) axis.
    acc_ref[...] += jax.lax.dot_general(
        x_rows, x_full,
        dimension_numbers=(((2,), (2,)), ((0,), (0,))),
        preferred_element_type=jnp.float32)                  # (bt, tc, C)

    @pl.when(k == pl.num_programs(2) - 1)
    def _finalize():
        energy = acc_ref[...]
        # softmax(rowmax(E) - E) == exp(rowmin(E) - E)/sum (shift-invariant).
        row_min = jnp.min(energy, axis=-1, keepdims=True)
        p = jnp.exp(row_min - energy)
        denom = jnp.sum(p, axis=-1, keepdims=True)
        attn_ref[...] = (p * pl.reciprocal(denom, approx=False)
                         ).astype(attn_ref.dtype)


def _cam_apply_kernel(gamma_ref, attn_ref, x_ref, o_ref, *, tc):
    """Pass 2: out = gamma * (attention @ xf) + xf, streamed over N tiles.

    attn_ref: (bt, tc, C)   attention row-tile (x.dtype, resident across k)
    x_ref:    (bt, C, tn)   input tile (native dtype)
    o_ref:    (bt, tc, tn)  output tile
    """
    ci = pl.program_id(1)
    x_full = x_ref[...]                                      # (bt, C, tn)
    attn = attn_ref[...]                                     # (bt, tc, C)
    out = jax.lax.dot_general(
        attn, x_full,
        dimension_numbers=(((2,), (1,)), ((0,), (0,))),
        preferred_element_type=jnp.float32)                  # (bt, tc, tn) f32
    if tc == x_ref.shape[1]:
        x_rows = x_full
    else:
        row0 = pl.multiple_of(ci * tc, 8)
        x_rows = x_ref[:, pl.ds(row0, tc), :]
    gamma = gamma_ref[0]
    o_ref[...] = (gamma * out + x_rows.astype(jnp.float32)).astype(o_ref.dtype)


# ---------------------------------------------------------------------------
# Tiling heuristics (generation-aware)
# ---------------------------------------------------------------------------
def _vmem_budgets():
    """Scoped-VMEM limit and a per-block byte budget for this TPU generation."""
    cap = None
    try:
        cap = getattr(pltpu.get_tpu_info(), "vmem_capacity_bytes", None)
    except Exception:  # pragma: no cover - interpret mode / old runtimes
        cap = None
    if not cap:
        cap = 64 * 1024 * 1024                    # conservative (v7x per-core)
    if cap <= 64 * 1024 * 1024:                   # v7x-class: 64 MiB physical
        vmem_limit = 32 * 1024 * 1024
    else:                                         # v5e / v6e: 128 MiB physical
        vmem_limit = 64 * 1024 * 1024
    return vmem_limit, vmem_limit // 8            # ~6-8 live blocks per pass


def _choose_spatial_tile(Np, C, itemsize, budget):
    """Largest lane-aligned tn dividing Np within the per-block budget.

    Np is always a multiple of 128 (padded by the wrapper); tn prefers
    multiples of 256 so v6e/v7x 256x256 MXU tiles stay full.
    """
    max_tn = max(128, budget // max(1, C * itemsize))
    if Np <= max_tn:
        return Np
    t = (max_tn // 256) * 256
    while t >= 256:
        if Np % t == 0:
            return t
        t -= 256
    t = (max_tn // 128) * 128
    while t >= 128:
        if Np % t == 0:
            return t
        t -= 128
    return 128


def _choose_row_tile(C, bt, attn_itemsize, budget, prefer_split):
    """Row tile tc over C (f32 accumulator + attention block must fit)."""
    if C % 8 != 0:
        return C                                   # full-dim block is legal
    per_row = bt * C * (4 + attn_itemsize)
    cands = [d for d in range(C, 7, -8) if C % d == 0]
    fitting = [d for d in cands if d * per_row <= budget] or [8]
    tc = fitting[0]
    if prefer_split and tc == C and len(fitting) > 1:
        tc = fitting[1]                            # >=2 row tiles -> both TCs
    return tc


def _choose_batch_block(B, per_image_bytes, budget):
    """Pack several images per grid step when they are small (amortize step cost)."""
    hi = min(B, max(1, budget // max(1, per_image_bytes)))
    for bt in range(hi, 0, -1):
        if B % bt == 0:
            return bt
    return 1


# ---------------------------------------------------------------------------
# Wrapper
# ---------------------------------------------------------------------------
def cam_module(x, gamma, *, force_two_pass=False, tn_override=None,
               tc_override=None):
    """Channel attention module (CAM).

    Args:
      x:     (B, C, H, W) array (NCHW), float32 or bfloat16.
      gamma: scalar / (1,) float32 learnable scale (PyTorch init: zeros).

    Returns:
      (B, C, H, W) array, same dtype as x.
    """
    B, C, H, W = x.shape
    N = H * W
    itemsize = x.dtype.itemsize
    vmem_limit, block_budget = _vmem_budgets()

    gamma = jnp.asarray(gamma, dtype=jnp.float32).reshape((1,))

    # Lane-align the spatial axis with zero padding (neutral: zero columns
    # contribute nothing to energy nor to attention @ x; padded outputs are
    # sliced away).
    Np = -(-N // 128) * 128
    x_flat = x.reshape(B, C, N)
    if Np != N:
        x_flat = jnp.pad(x_flat, ((0, 0), (0, 0), (0, Np - N)))

    # ---------------- single-launch fused path (image fits VMEM) -----------
    per_image_fused = (2 * 2 * C * Np * itemsize      # double-buffered x + out
                       + C * Np * 4                   # f32 matmul result
                       + 2 * C * C * 4)               # energy + attention f32
    if not force_two_pass and per_image_fused <= vmem_limit // 2:
        bt = _choose_batch_block(B, per_image_fused, vmem_limit // 2)
        out_flat = pl.pallas_call(
            _cam_fused_kernel,
            out_shape=jax.ShapeDtypeStruct((B, C, Np), x.dtype),
            grid_spec=pltpu.PrefetchScalarGridSpec(
                num_scalar_prefetch=0,
                grid=(B // bt,),
                in_specs=[
                    pl.BlockSpec(memory_space=pltpu.MemorySpace.SMEM),  # gamma
                    pl.BlockSpec((bt, C, Np), lambda b: (b, 0, 0)),     # x
                ],
                out_specs=pl.BlockSpec((bt, C, Np), lambda b: (b, 0, 0)),
            ),
            compiler_params=pltpu.CompilerParams(
                dimension_semantics=("parallel",),
                vmem_limit_bytes=vmem_limit,
            ),
        )(gamma, x_flat)
        if Np != N:
            out_flat = out_flat[:, :, :N]
        return out_flat.reshape(B, C, H, W)

    # --------------------- streamed two-pass path --------------------------
    attn_dtype = x.dtype                      # emit attention in input dtype
    attn_isz = jnp.dtype(attn_dtype).itemsize

    tn = tn_override or _choose_spatial_tile(Np, C, itemsize, block_budget)
    bt = _choose_batch_block(
        B, max(C * tn * itemsize, C * C * (4 + attn_isz)), block_budget)
    b_steps = B // bt
    n_tiles = Np // tn

    # Pass-1 row tile: bounds the (tc, C) accumulator and, when the batch axis
    # alone cannot (b_steps == 1), gives v7x's second TensorCore its own rows.
    tc1 = tc_override or _choose_row_tile(
        C, bt, attn_isz, block_budget,
        prefer_split=(b_steps == 1 and C >= 16))
    c1_tiles = C // tc1

    attention = pl.pallas_call(
        functools.partial(_cam_attention_kernel, tc=tc1),
        out_shape=jax.ShapeDtypeStruct((B, C, C), attn_dtype),
        grid_spec=pltpu.PrefetchScalarGridSpec(
            num_scalar_prefetch=0,
            grid=(b_steps, c1_tiles, n_tiles),
            in_specs=[
                pl.BlockSpec((bt, C, tn), lambda b, c, k: (b, 0, k)),   # x
            ],
            out_specs=pl.BlockSpec((bt, tc1, C), lambda b, c, k: (b, c, 0)),
            scratch_shapes=[pltpu.VMEM((bt, tc1, C), jnp.float32)],
        ),
        compiler_params=pltpu.CompilerParams(
            dimension_semantics=("parallel", "parallel", "arbitrary"),
            vmem_limit_bytes=vmem_limit,
        ),
    )(x_flat)

    # Pass-2 row tile: prefer full C (x streamed only once); tile only when
    # the (bt, C, C) attention block would not fit the budget.
    tc2 = tc_override or _choose_row_tile(C, bt, attn_isz, block_budget,
                                          prefer_split=False)
    c2_tiles = C // tc2

    out_flat = pl.pallas_call(
        functools.partial(_cam_apply_kernel, tc=tc2),
        out_shape=jax.ShapeDtypeStruct((B, C, Np), x.dtype),
        grid_spec=pltpu.PrefetchScalarGridSpec(
            num_scalar_prefetch=0,
            grid=(b_steps, c2_tiles, n_tiles),
            in_specs=[
                pl.BlockSpec(memory_space=pltpu.MemorySpace.SMEM),       # gamma
                pl.BlockSpec((bt, tc2, C), lambda b, c, k: (b, c, 0)),   # attn
                pl.BlockSpec((bt, C, tn), lambda b, c, k: (b, 0, k)),    # x
            ],
            out_specs=pl.BlockSpec((bt, tc2, tn), lambda b, c, k: (b, c, k)),
        ),
        compiler_params=pltpu.CompilerParams(
            dimension_semantics=("parallel", "parallel", "parallel"),
            vmem_limit_bytes=vmem_limit,
        ),
    )(gamma, attention, x_flat)

    if Np != N:
        out_flat = out_flat[:, :, :N]
    return out_flat.reshape(B, C, H, W)

    # TODO(synk): optional bf16 casting of f32 matmul operands (v6e/v7x fast
    # MXU path) is intentionally not applied to keep f32 tolerances tight.


# ---------------------------------------------------------------------------
# Pure-JAX reference for validation
# ---------------------------------------------------------------------------
def cam_reference(x, gamma):
    B, C, H, W = x.shape
    xf = x.reshape(B, C, H * W).astype(jnp.float32)
    energy = jnp.einsum("bcn,bdn->bcd", xf, xf,
                        precision=jax.lax.Precision.HIGHEST)
    energy_new = jnp.max(energy, axis=-1, keepdims=True) - energy
    attention = jax.nn.softmax(energy_new, axis=-1)
    out = jnp.einsum("bcd,bdn->bcn", attention, xf,
                     precision=jax.lax.Precision.HIGHEST).reshape(B, C, H, W)
    g = jnp.asarray(gamma, dtype=jnp.float32).reshape(())
    return (g * out + x.astype(jnp.float32)).astype(x.dtype)


if __name__ == "__main__":
    key = jax.random.PRNGKey(0)

    # ---- test 1: small shape (fused single-launch path) --------------------
    B, C, H, W = 2, 4, 16, 16
    x = jax.random.normal(key, (B, C, H, W), dtype=jnp.float32)
    gamma_zero = jnp.zeros((1,), dtype=jnp.float32)   # PyTorch init
    gamma_nz = jnp.array([0.5], dtype=jnp.float32)

    out0 = jax.block_until_ready(cam_module(x, gamma_zero))
    out1 = jax.block_until_ready(cam_module(x, gamma_nz))
    ref0 = cam_reference(x, gamma_zero)
    ref1 = cam_reference(x, gamma_nz)
    assert jnp.allclose(out0, ref0, atol=1e-4, rtol=1e-4)
    assert jnp.allclose(out1, ref1, atol=1e-4, rtol=1e-4)

    # ---- test 2: exercise the streamed two-pass path (forced) --------------
    key2 = jax.random.PRNGKey(1)
    x2 = jax.random.normal(key2, (1, 128, 32, 32), dtype=jnp.float32)
    out2 = jax.block_until_ready(
        cam_module(x2, gamma_nz, force_two_pass=True,
                   tn_override=256, tc_override=64))
    ref2 = cam_reference(x2, gamma_nz)
    assert jnp.allclose(out2, ref2, atol=1e-2, rtol=1e-2)

    print("KERNEL_OK")
</pallas_src>

<mosaic_0001>
module attributes {stable_mosaic.version = 11 : i64} {
  func.func @_cam_fused_kernel(%arg0: i32, %arg1: memref<1xf32, #tpu.memory_space<smem>>, %arg2: memref<2x4x256xf32, #tpu.memory_space<vmem>>, %arg3: memref<2x4x256xf32, #tpu.memory_space<vmem>>) attributes {dimension_semantics = [#tpu.dimension_semantics<parallel>], iteration_bounds = array<i64: 1>, scalar_prefetch = 0 : i64, scratch_operands = 0 : i64, tpu.core_type = #tpu.core_type<tc>, window_params = [{transform_indices = @transform_0, window_bounds = array<i64: 1>}, {transform_indices = @transform_1, window_bounds = array<i64: 2, 4, 256>}, {transform_indices = @transform_2, window_bounds = array<i64: 2, 4, 256>}]} {
    %c0 = arith.constant 0 : index
    %c0_0 = arith.constant 0 : index
    %c0_1 = arith.constant 0 : index
    %0 = vector.load %arg2[%c0, %c0_0, %c0_1] : memref<2x4x256xf32, #tpu.memory_space<vmem>>, vector<2x4x256xf32>
    %cst = arith.constant dense<0.000000e+00> : vector<2x4x4xf32>
    %1 = tpu.matmul %0, %0, %cst {dimension_numbers = #tpu.dot_dimension_numbers<[2], [2], [1], [1], [0, 0, 0, 1, 1, 1], [0], [0]>} : vector<2x4x256xf32>, vector<2x4x256xf32>, vector<2x4x4xf32> -> vector<2x4x4xf32>
    %cst_2 = arith.constant dense<0x7F800000> : vector<2x4xf32>
    %2 = vector.multi_reduction <minimumf>, %1, %cst_2 [2] : vector<2x4x4xf32> to vector<2x4xf32>
    %3 = vector.shape_cast %2 : vector<2x4xf32> to vector<2x4x1xf32>
    %4 = vector.broadcast %3 : vector<2x4x1xf32> to vector<2x4x4xf32>
    %5 = arith.subf %4, %1 : vector<2x4x4xf32>
    %6 = math.exp %5 : vector<2x4x4xf32>
    %cst_3 = arith.constant dense<0.000000e+00> : vector<2x4xf32>
    %7 = vector.multi_reduction <add>, %6, %cst_3 [2] : vector<2x4x4xf32> to vector<2x4xf32>
    %8 = vector.shape_cast %7 : vector<2x4xf32> to vector<2x4x1xf32>
    %9 = tpu.reciprocal %8 : vector<2x4x1xf32> -> vector<2x4x1xf32>
    %10 = vector.broadcast %9 : vector<2x4x1xf32> to vector<2x4x4xf32>
    %11 = arith.mulf %6, %10 : vector<2x4x4xf32>
    %cst_4 = arith.constant dense<0.000000e+00> : vector<2x4x256xf32>
    %12 = tpu.matmul %11, %0, %cst_4 {dimension_numbers = #tpu.dot_dimension_numbers<[2], [1], [1], [2], [0, 0, 0, 1, 1, 2], [0], [0]>} : vector<2x4x4xf32>, vector<2x4x256xf32>, vector<2x4x256xf32> -> vector<2x4x256xf32>
    %c0_5 = arith.constant 0 : index
    %13 = memref.load %arg1[%c0_5] : memref<1xf32, #tpu.memory_space<smem>>
    %14 = vector.broadcast %13 : f32 to vector<2x4x256xf32>
    %15 = arith.mulf %14, %12 : vector<2x4x256xf32>
    %16 = arith.addf %15, %0 : vector<2x4x256xf32>
    %c0_6 = arith.constant 0 : index
    %c0_7 = arith.constant 0 : index
    %c0_8 = arith.constant 0 : index
    %17 = vector.load %arg3[%c0_6, %c0_7, %c0_8] : memref<2x4x256xf32, #tpu.memory_space<vmem>>, vector<2x4x256xf32>
    tpu.vector_store %arg3[%c0_6, %c0_7, %c0_8], %16 {strides = array<i32>} : memref<2x4x256xf32, #tpu.memory_space<vmem>>, vector<2x4x256xf32>,
    return
  }
  func.func @transform_0(%arg0: i32) -> i32 {
    %c0_i32 = arith.constant 0 : i32
    %c0_i32_0 = arith.constant 0 : i32
    return %c0_i32 : i32
  }
  func.func @transform_1(%arg0: i32) -> (i32, i32, i32) {
    %c0_i32 = arith.constant 0 : i32
    %c0_i32_0 = arith.constant 0 : i32
    %c0_i32_1 = arith.constant 0 : i32
    return %arg0, %c0_i32, %c0_i32_0 : i32, i32, i32
  }
  func.func @transform_2(%arg0: i32) -> (i32, i32, i32) {
    %c0_i32 = arith.constant 0 : i32
    %c0_i32_0 = arith.constant 0 : i32
    %c0_i32_1 = arith.constant 0 : i32
    return %arg0, %c0_i32, %c0_i32_0 : i32, i32, i32
  }
}

</mosaic_0001>

<bundles_post_ra>
// kernel: tpu_custom_call.1
= control target key start
LH: loop header
LB: loop body
LE: loop exit
PB: predicated region body
PF: predicated region fallthrough
CT: control target
= control target key end

     0   :  { %8 = vsyncpa [#allocation4], 0  ;;  %s511_s0 = inlined_call_operand.<no memory space> [shape: f32[1], index: 0, kind: input, shape index: {}]   ;;  %s512_s1 = inlined_call_operand.hbm [shape: f32[2,4,256], index: 1, kind: input, shape index: {}]   ;;  %s513_s2 = inlined_call_operand.hbm [shape: f32[2,4,256], index: 2, kind: output, shape index: {}]  }
   0x1   :  { %9 = vsyncpa [#allocation5], 0  ;;  %s458_s9 = smov [#allocation3]  }
   0x2   :  { %s17_s10 = sshll.u32 %s458_s9, 4  ;;  %s18_s10 = int_to_ptr.vmem [resolvable:$true] %s17_s10 }
   0x3   :  { %s422_s11 = scalar_lea.vmem %s18_s10, 256  ;;  %p427_p1 = scmp.lt.s32.totalorder %s18_s10, %s18_s10 }
   0x4   :  { %p423_p0 = scmp.ne.s32.totalorder %s18_s10, %s422_s11  ;;  %p428_p2 = scmp.lt.s32.totalorder %s422_s11, %s422_s11 }
   0x6   :  { %p429_p3 = por %p428_p2, %p427_p1 }
   0x8   :  { %p430_p4 = pnand %p429_p3, %p423_p0 }
   0xa   :  { %433 = shalt.err (!%p430_p4)
}
   0xb   :  { %s459_s12 = smov 128   ;;  %s460_s13 = smov 8  }
   0xc   :  { %23 = dma.hbm_to_vmem [thread:$0]  %s512_s1, 256, %s18_s10, [#allocation4], %s459_s12, %s459_s12, %s460_s13  }
   0xd   :  { %454 = dma.done.wait [#allocation4], 256  }
   0xe   :  { %455 = vsyncadd [#allocation4], 4294967040  ;;  %v27_v0 = vld [vmem:[#allocation3] sm:$0xff]  ;;  %v484_v1 = vld [vmem:[#allocation3 + $0x8] sm:$0xff]  ;;  %vm175_vm0 = vcmask 27648   ;;  %vm202_vm1 = vcmask 1043456   ;;  %v357_v27 = vstv %s511_s0 }
   0xf   :  { %v30_v2 = vcombine.high %v27_v0, %v27_v0  ;;  %v488_v3 = vcombine.high %v484_v1, %v484_v1  ;;  %v461_v20 = vmov 0.0   ;;  %vm198_vm2 = vcmask 31744   ;;  %s462_s17 = smov [#allocation6]  }
  0x10   :  { %s381_s18 = sshll.u32 %s462_s17, 4  ;;  %s382_s18 = int_to_ptr.vmem [resolvable:$true] %s381_s18 }
  0x11   :  { %62 = vmatprep.subr.mxu0 %v30_v2  ;;  %135 = vmatprep.subr.mxu1 %v488_v3  ;;  %s434_s0 = scalar_lea.vmem %s382_s18, 256  ;;  %p439_p6 = scmp.lt.s32.totalorder %s382_s18, %s382_s18 }
  0x12   :  { %63 = vmatpush1.xpose.msra.mxu0 %v27_v0  ;;  %96 = vmatprep.mubr.f32.mxu0 %v30_v2  ;;  %p435_p5 = scmp.ne.s32.totalorder %s382_s18, %s434_s0  ;;  %p440_p7 = scmp.lt.s32.totalorder %s434_s0, %s434_s0 }
  0x13   :  { %136 = vmatpush1.xpose.msra.mxu1 %v484_v1  ;;  %169 = vmatprep.mubr.f32.mxu1 %v488_v3 }
  0x14   :  { %393 = vmatprep.subr.msk.mxu0 %vm202_vm1, %v30_v2  ;;  %396 = vmatprep.subr.msk.mxu1 %vm202_vm1, %v488_v3  ;;  %p441_p8 = por %p440_p7, %p439_p6 }
  0x15   :  { %97 = vmatmul.mubr.f32.vlgmr.msra.gmra.mxu0 %v27_v0 }
  0x16   :  { %170 = vmatmul.mubr.f32.vlgmr.msra.gmra.mxu1 %v484_v1  ;;  %271 = vmatprep.mubr.f32.mxu0 %v461_v20  ;;  %p442_p9 = pnand %p441_p8, %p435_p5 }
  0x17   :  { %394 = vmatpush1.msk.msra.mxu0 %vm202_vm1, %v27_v0  ;;  %397 = vmatpush1.msk.msra.mxu1 %vm202_vm1, %v484_v1 }
  0x18   :  { %349 = vmatprep.mubr.f32.mxu1 %v461_v20 }
  0xd5   :  { %v98_v4 = vpop.f32.mrf.mxu0 }
  0xd6   :  { %v171_v5 = vpop.f32.mrf.mxu1  ;;  %v176_v6 = vsel %vm175_vm0, %v98_v4, inf }
  0xd7   :  { %177 = vmin.xlane.f32.xlu0 %v176_v6  ;;  %v100_v7 = vpop.f32.mrf.mxu0  ;;  %v179_v9 = vsel %vm175_vm0, %v171_v5, inf }
  0xd8   :  { %v173_v8 = vpop.f32.mrf.mxu1 }
  0xdb   :  { %180 = vmin.xlane.f32.xlu0 %v179_v9 }
 0x160   :  { %v178_v10 = vpop.xlane.xlu0 %177 }
 0x161   :  { %v182_v11 = vsub.f32 %v178_v10, %v98_v4 }
 0x163   :  { %v184_v12 = vmul.f32 1.442695, %v182_v11 }
 0x164   :  { %v181_v13 = vpop.xlane.xlu0 %180 }
 0x165   :  { %406 = vpow2.f32 %v184_v12  ;;  %v183_v14 = vsub.f32 %v181_v13, %v171_v5 }
 0x167   :  { %v186_v15 = vmul.f32 1.442695, %v183_v14 }
 0x169   :  { %408 = vpow2.f32 %v186_v15 }
 0x172   :  { %v407_v16 = vpop.eup %406 }
 0x173   :  { %v188_v17 = vsel %vm175_vm0, %v407_v16, 0.0 }
 0x174   :  { %189 = vadd.xlane.f32.xlu1 %v188_v17 }
 0x176   :  { %v409_v18 = vpop.eup %408 }
 0x177   :  { %v191_v19 = vsel %vm175_vm0, %v409_v18, 0.0 }
 0x178   :  { %192 = vadd.xlane.f32.xlu1 %v191_v19 }
 0x1fd   :  { %v190_v21 = vpop.xlane.xlu1 %189 }
 0x1fe   :  { %410 = vrcp.f32 %v190_v21 }
 0x201   :  { %v193_v22 = vpop.xlane.xlu1 %192 }
 0x202   :  { %412 = vrcp.f32 %v193_v22 }
 0x20b   :  { %v411_v23 = vpop.eup %410 }
 0x20c   :  { %v196_v24 = vmul.f32 %v411_v23, %v407_v16 }
 0x20e   :  { %395 = vmatmul.mubr.msk.f32.vlgmr.msra.gmra.mxu0 %vm198_vm2, %v196_v24 }
 0x20f   :  { %v413_v25 = vpop.eup %412 }
 0x210   :  { %v197_v26 = vmul.f32 %v413_v25, %v409_v18 }
 0x212   :  { %398 = vmatmul.mubr.msk.f32.vlgmr.msra.gmra.mxu1 %vm198_vm2, %v197_v26 }
 0x2ce   :  { %v273_v28 = vpop.f32.mrf.mxu0 }
 0x2cf   :  { %v358_v29 = vmul.f32 %v357_v27, %v273_v28 }
 0x2d0   :  { %v275_v30 = vpop.f32.mrf.mxu0 }
 0x2d1   :  { %v359_v31 = vmul.f32 %v357_v27, %v275_v30  ;;  %v362_v33 = vadd.f32 %v358_v29, %v27_v0 }
 0x2d2   :  { %v351_v32 = vpop.f32.mrf.mxu1 }
 0x2d3   :  { %v363_v34 = vadd.f32 %v359_v31, %v30_v2  ;;  %v360_v35 = vmul.f32 %v357_v27, %v351_v32 }
 0x2d4   :  { %v353_v36 = vpop.f32.mrf.mxu1 }
 0x2d5   :  { %v370_v37 = vcombine.low %v362_v33, %v363_v34  ;;  %v361_v38 = vmul.f32 %v357_v27, %v353_v36  ;;  %v364_v39 = vadd.f32 %v360_v35, %v484_v1 }
 0x2d7   :  { %374 = vst [vmem:[#allocation6] sm:$0xff] %v370_v37  ;;  %v365_v40 = vadd.f32 %v361_v38, %v488_v3 }
 0x2d9   :  { %v371_v41 = vcombine.low %v364_v39, %v365_v40 }
 0x2db   :  { %375 = vst [vmem:[#allocation6 + $0x8] sm:$0xff] %v371_v41 }
 0x2dc   :  { %445 = shalt.err (!%p442_p9)
}
 0x2dd   :  { %387 = dma.vmem_to_hbm [thread:$0]  %s382_s18, 256, %s513_s2, [#allocation5], %s459_s12, %s459_s12, %s460_s13  }
 0x2de   :  { %456 = dma.done.wait [#allocation5], 256  }
 0x2df   :  { %457 = vsyncadd [#allocation5], 4294967040 }
 0x2e0   :  { %391 = vsyncpa [#allocation4], 1 }
 0x2e1   :  { %392 = vsyncpa [#allocation5], 1 }

</bundles_post_ra>
